<compile_context>
chip_gen: v7x
topology: tpu7x:2x2x1
jax: 0.10.0
libtpu: 0.0.40
codegen_flags: <defaults>
</compile_context>

<pallas_src>
import math

import jax
import jax.numpy as jnp
from jax.experimental import pallas as pl
from jax.experimental.pallas import tpu as pltpu


# ---------------------------------------------------------------------------
# "init": build the sinusoidal positional embedding buffer (matches PyTorch)
# ---------------------------------------------------------------------------
def make_sinusoidal_pe(channels, spatial_size, dtype=jnp.float32):
    # The PyTorch module implicitly requires an even channel count (cos/sin
    # halves); odd channels would break its forward add as well.
    assert channels % 2 == 0, "channels must be even for cos/sin split"
    spatial_dims = len(spatial_size)
    freqs = jnp.exp(
        jnp.arange(0, channels, 2, dtype=jnp.float32)
        * (-math.log(10000.0) / channels)
    )
    theta = jnp.zeros((1, freqs.shape[0]) + tuple(1 for _ in spatial_size),
                      dtype=jnp.float32)
    for dim, size in enumerate(spatial_size):
        p_size = [size if j == dim else 1 for j in range(spatial_dims)]
        pos = jnp.arange(size, dtype=jnp.float32).reshape(1, 1, *p_size)
        omega = freqs.reshape(1, -1, *([1] * spatial_dims))
        theta = theta + omega * pos
    pe = jnp.concatenate((jnp.cos(theta), jnp.sin(theta)), axis=1)
    return pe.astype(dtype)  # (1, C, *spatial_size)


# ---------------------------------------------------------------------------
# Pallas kernel: broadcast add (pe block has leading dim 1), explicit cast
# ---------------------------------------------------------------------------
def _add_pe_kernel(x_ref, pe_ref, o_ref):
    o_ref[...] = (x_ref[...] + pe_ref[...]).astype(o_ref.dtype)


_LANES = 128
# Scoped-VMEM limit we request (safe on every generation: physical VMEM is
# 128 MiB on v5e/v6e and 64 MiB per TC on v7x).
_VMEM_LIMIT_BYTES = 32 * 1024 * 1024
# Sum of all live double-buffered blocks (x + pe + out, 2 buffers each).
_TOTAL_BLOCK_BUDGET = 16 * 1024 * 1024
# Per-buffer cap for the pe block (1-4 MiB per buffer is the measured sweet spot).
_MAX_PE_BLOCK_BYTES = 4 * 1024 * 1024


def _sublane_multiple(*dtypes):
    """Second-minor block-dim granularity: 8 (32-bit), 16 (bf16/fp16), 32 (8-bit)."""
    min_item = min(jnp.dtype(d).itemsize for d in dtypes)
    return 8 * max(1, 4 // min_item)


def _pick_tile_rows(rows, live_bytes_per_row, pe_bytes_per_row, sub):
    """Largest row tile that keeps the double-buffered footprint in budget.

    If the whole row extent fits, use it (a full-dim block is always legal);
    otherwise use a multiple of the dtype-aware sublane granularity and let the
    ragged tail block be masked by Pallas (grid uses pl.cdiv).
    """
    max_rows = min(_TOTAL_BLOCK_BUDGET // max(live_bytes_per_row, 1),
                   _MAX_PE_BLOCK_BYTES // max(pe_bytes_per_row, 1))
    max_rows = max(max_rows, sub)
    if rows <= max_rows:
        return rows
    return max(sub, (max_rows // sub) * sub)


def _pallas_add_pe(x, pe):
    orig_shape = x.shape
    B = x.shape[0]
    N = math.prod(x.shape[1:])

    out_dtype = jnp.promote_types(x.dtype, pe.dtype)  # PyTorch-style promotion
    x_item = jnp.dtype(x.dtype).itemsize
    pe_item = jnp.dtype(pe.dtype).itemsize
    out_item = jnp.dtype(out_dtype).itemsize
    sub = _sublane_multiple(x.dtype, pe.dtype, out_dtype)

    xf = x.reshape(B, N)
    pf = pe.reshape(1, N)

    cost = pl.CostEstimate(
        flops=B * N,
        transcendentals=0,
        bytes_accessed=B * N * x_item + N * pe_item + B * N * out_item,
    )

    if N % _LANES == 0:
        # -------- lane- and sublane-dense (B, rows, 128) layout --------------
        rows = N // _LANES
        xr = xf.reshape(B, rows, _LANES)
        pr = pf.reshape(1, rows, _LANES)

        # Fold the batch into the block whenever even the smallest legal block
        # fits the budget (true for any realistic B); otherwise keep batch as
        # an innermost grid axis so the pe block is still reused across it.
        min_block_live = 2 * sub * _LANES * (B * (x_item + out_item) + pe_item)
        fold_batch = min_block_live <= _TOTAL_BLOCK_BUDGET

        if fold_batch:
            live_per_row = 2 * _LANES * (B * (x_item + out_item) + pe_item)
            tr = _pick_tile_rows(rows, live_per_row, _LANES * pe_item, sub)
            grid = (pl.cdiv(rows, tr),)
            in_specs = [
                pl.BlockSpec((B, tr, _LANES), lambda t: (0, t, 0)),
                pl.BlockSpec((1, tr, _LANES), lambda t: (0, t, 0)),
            ]
            out_spec = pl.BlockSpec((B, tr, _LANES), lambda t: (0, t, 0))
            dims = ("parallel",)
        else:
            live_per_row = 2 * _LANES * (x_item + out_item + pe_item)
            tr = _pick_tile_rows(rows, live_per_row, _LANES * pe_item, sub)
            grid = (pl.cdiv(rows, tr), B)  # batch innermost -> pe block reused
            in_specs = [
                pl.BlockSpec((1, tr, _LANES), lambda t, b: (b, t, 0)),
                pl.BlockSpec((1, tr, _LANES), lambda t, b: (0, t, 0)),
            ]
            out_spec = pl.BlockSpec((1, tr, _LANES), lambda t, b: (b, t, 0))
            dims = ("parallel", "arbitrary")

        out_shape = jax.ShapeDtypeStruct((B, rows, _LANES), out_dtype)
        args = (xr, pr)
    else:
        # -------- fallback: tile the flat (B, N) element axis directly -------
        # No padding / slicing: the block width is a multiple of 128 lanes and
        # the ragged tail block is masked.  VMEM accounting uses the padded
        # (round-up-to-8 sublanes, 32-bit tile) footprint to stay conservative.
        b_pad = ((B + 7) // 8) * 8
        live_per_col = 2 * 4 * (2 * b_pad + 8)         # x + out + pe, 2 buffers
        tn = min(_TOTAL_BLOCK_BUDGET // live_per_col,
                 _MAX_PE_BLOCK_BYTES // (8 * 4))
        tn = max(_LANES, (tn // _LANES) * _LANES)
        if tn >= N:
            tn = N                                      # single full block
        grid = (pl.cdiv(N, tn),)
        in_specs = [
            pl.BlockSpec((B, tn), lambda t: (0, t)),
            pl.BlockSpec((1, tn), lambda t: (0, t)),
        ]
        out_spec = pl.BlockSpec((B, tn), lambda t: (0, t))
        dims = ("parallel",)
        out_shape = jax.ShapeDtypeStruct((B, N), out_dtype)
        args = (xf, pf)

    out = pl.pallas_call(
        _add_pe_kernel,
        out_shape=out_shape,
        grid_spec=pltpu.PrefetchScalarGridSpec(
            num_scalar_prefetch=0,
            grid=grid,
            in_specs=in_specs,
            out_specs=out_spec,
        ),
        compiler_params=pltpu.CompilerParams(
            dimension_semantics=dims,
            vmem_limit_bytes=_VMEM_LIMIT_BYTES,
        ),
        cost_estimate=cost,
    )(*args)

    return out.reshape((B,) + orig_shape[1:]).reshape(orig_shape)


# ---------------------------------------------------------------------------
# Forward wrapper (module.forward equivalent)
# ---------------------------------------------------------------------------
def sinusoidal_pos_embed_forward(x, pe, *, force_pallas=False):
    assert pe.shape == (1,) + x.shape[1:], (pe.shape, x.shape)

    # For tiny tensors (< ~1 MiB of output) launch + per-step overhead dwarfs
    # the add; a fused XLA add is strictly better there.
    out_item = jnp.dtype(jnp.promote_types(x.dtype, pe.dtype)).itemsize
    if not force_pallas and math.prod(x.shape) * out_item < (1 << 20):
        return x + pe

    return _pallas_add_pe(x, pe)


if __name__ == "__main__":
    # Module config consistent with the PyTorch __init__:
    channels = 4
    spatial_size = (16, 16)
    B = 2

    pe = make_sinusoidal_pe(channels, spatial_size)  # (1, 4, 16, 16)

    key = jax.random.PRNGKey(0)
    x = jax.random.normal(key, (B, channels) + tuple(spatial_size),
                          dtype=jnp.float32)  # (2, 4, 16, 16)

    # force_pallas so the demo exercises the kernel despite the tiny shape.
    out = sinusoidal_pos_embed_forward(x, pe, force_pallas=True)
    out = jax.block_until_ready(out)

    # Sanity check against a pure-JAX reference of the module's forward.
    ref = x + pe
    assert out.shape == x.shape and out.dtype == ref.dtype
    assert jnp.allclose(out, ref, atol=1e-6, rtol=1e-6)

    print("KERNEL_OK")
</pallas_src>

<mosaic_0001>
module attributes {stable_mosaic.version = 11 : i64} {
  func.func @_add_pe_kernel(%arg0: i32, %arg1: memref<2x8x128xf32, #tpu.memory_space<vmem>>, %arg2: memref<1x8x128xf32, #tpu.memory_space<vmem>>, %arg3: memref<2x8x128xf32, #tpu.memory_space<vmem>>) attributes {dimension_semantics = [#tpu.dimension_semantics<parallel>], iteration_bounds = array<i64: 1>, scalar_prefetch = 0 : i64, scratch_operands = 0 : i64, tpu.core_type = #tpu.core_type<tc>, window_params = [{transform_indices = @transform_0, window_bounds = array<i64: 2, 8, 128>}, {transform_indices = @transform_1, window_bounds = array<i64: 1, 8, 128>}, {transform_indices = @transform_2, window_bounds = array<i64: 2, 8, 128>}]} {
    %c0 = arith.constant 0 : index
    %c0_0 = arith.constant 0 : index
    %c0_1 = arith.constant 0 : index
    %0 = vector.load %arg1[%c0, %c0_0, %c0_1] : memref<2x8x128xf32, #tpu.memory_space<vmem>>, vector<2x8x128xf32>
    %c0_2 = arith.constant 0 : index
    %c0_3 = arith.constant 0 : index
    %c0_4 = arith.constant 0 : index
    %1 = vector.load %arg2[%c0_2, %c0_3, %c0_4] : memref<1x8x128xf32, #tpu.memory_space<vmem>>, vector<1x8x128xf32>
    %2 = vector.broadcast %1 : vector<1x8x128xf32> to vector<2x8x128xf32>
    %3 = arith.addf %0, %2 : vector<2x8x128xf32>
    %c0_5 = arith.constant 0 : index
    %c0_6 = arith.constant 0 : index
    %c0_7 = arith.constant 0 : index
    %4 = vector.load %arg3[%c0_5, %c0_6, %c0_7] : memref<2x8x128xf32, #tpu.memory_space<vmem>>, vector<2x8x128xf32>
    tpu.vector_store %arg3[%c0_5, %c0_6, %c0_7], %3 {strides = array<i32>} : memref<2x8x128xf32, #tpu.memory_space<vmem>>, vector<2x8x128xf32>,
    return
  }
  func.func @transform_0(%arg0: i32) -> (i32, i32, i32) {
    %c0_i32 = arith.constant 0 : i32
    %c0_i32_0 = arith.constant 0 : i32
    %c0_i32_1 = arith.constant 0 : i32
    return %c0_i32, %arg0, %c0_i32_0 : i32, i32, i32
  }
  func.func @transform_1(%arg0: i32) -> (i32, i32, i32) {
    %c0_i32 = arith.constant 0 : i32
    %c0_i32_0 = arith.constant 0 : i32
    %c0_i32_1 = arith.constant 0 : i32
    return %c0_i32, %arg0, %c0_i32_0 : i32, i32, i32
  }
  func.func @transform_2(%arg0: i32) -> (i32, i32, i32) {
    %c0_i32 = arith.constant 0 : i32
    %c0_i32_0 = arith.constant 0 : i32
    %c0_i32_1 = arith.constant 0 : i32
    return %c0_i32, %arg0, %c0_i32_0 : i32, i32, i32
  }
}

</mosaic_0001>

<bundles_post_ra>
// kernel: tpu_custom_call.1
= control target key start
LH: loop header
LB: loop body
LE: loop exit
PB: predicated region body
PF: predicated region fallthrough
CT: control target
= control target key end

     0   :  { %7 = vsyncpa [#allocation3], 0  ;;  %s202_s0 = inlined_call_operand.hbm [shape: f32[2,8,128], index: 0, kind: input, shape index: {}]   ;;  %s203_s1 = inlined_call_operand.hbm [shape: f32[1,8,128], index: 1, kind: input, shape index: {}]   ;;  %s204_s2 = inlined_call_operand.hbm [shape: f32[2,8,128], index: 2, kind: output, shape index: {}]  }
   0x1   :  { %8 = vsyncpa [#allocation6], 0 }
   0x2   :  { %9 = vsyncpa [#allocation4], 0  ;;  %s140_s9 = smov [#allocation2]   ;;  %s68_s13 = scalar_lea.hbm %s202_s0, 256 }
   0x3   :  { %s15_s10 = sshll.u32 %s140_s9, 4  ;;  %p69_p0 = scmp.ne.s32.totalorder %s202_s0, %s68_s13  ;;  %s16_s10 = int_to_ptr.vmem [resolvable:$true] %s15_s10 }
   0x4   :  { %p72_p1 = scmp.lt.u32.totalorder %s68_s13, %s202_s0 }
   0x6   :  { %p74_p2 = pnand %p72_p1, %p69_p0 }
   0x8   :  { %77 = shalt.err (!%p74_p2)
}
   0x9   :  { %s78_s18 = scalar_lea.vmem %s16_s10, 256  ;;  %p83_p4 = scmp.lt.s32.totalorder %s16_s10, %s16_s10 }
   0xa   :  { %p79_p3 = scmp.ne.s32.totalorder %s16_s10, %s78_s18  ;;  %p84_p5 = scmp.lt.s32.totalorder %s78_s18, %s78_s18 }
   0xc   :  { %p85_p6 = por %p84_p5, %p83_p4 }
   0xe   :  { %p86_p7 = pnand %p85_p6, %p79_p3 }
  0x10   :  { %89 = shalt.err (!%p86_p7)
}
  0x11   :  { %s141_s19 = smov 128   ;;  %s142_s20 = smov 8  }
  0x12   :  { %21 = dma.hbm_to_vmem [thread:$0]  %s202_s0, 256, %s16_s10, [#allocation3], %s141_s19, %s141_s19, %s142_s20  }
  0x13   :  { %s143_s23 = smov [#allocation5]   ;;  %s90_s27 = scalar_lea.hbm %s203_s1, 128 }
  0x14   :  { %s28_s24 = sshll.u32 %s143_s23, 4  ;;  %p91_p8 = scmp.ne.s32.totalorder %s203_s1, %s90_s27  ;;  %s29_s24 = int_to_ptr.vmem [resolvable:$true] %s28_s24 }
  0x15   :  { %p94_p9 = scmp.lt.u32.totalorder %s90_s27, %s203_s1 }
  0x17   :  { %p96_p10 = pnand %p94_p9, %p91_p8 }
  0x19   :  { %99 = shalt.err (!%p96_p10)
}
  0x1a   :  { %s100_s4 = scalar_lea.vmem %s29_s24, 128  ;;  %p105_p12 = scmp.lt.s32.totalorder %s29_s24, %s29_s24 }
  0x1b   :  { %p101_p11 = scmp.ne.s32.totalorder %s29_s24, %s100_s4  ;;  %p106_p13 = scmp.lt.s32.totalorder %s100_s4, %s100_s4 }
  0x1d   :  { %p107_p0 = por %p106_p13, %p105_p12 }
  0x1f   :  { %p108_p1 = pnand %p107_p0, %p101_p11 }
  0x21   :  { %111 = shalt.err (!%p108_p1)
}
  0x22   :  { %31 = dma.hbm_to_vmem [thread:$0]  %s203_s1, 128, %s29_s24, [#allocation6]  }
  0x23   :  { %134 = dma.done.wait [#allocation3], 256  }
  0x24   :  { %135 = vsyncadd [#allocation3], 4294967040 }
  0x25   :  { %136 = dma.done.wait [#allocation6], 128  }
  0x26   :  { %137 = vsyncadd [#allocation6], 4294967168  ;;  %s144_s6 = smov [#allocation7]   ;;  %v38_v0 = vld [vmem:[#allocation2] sm:$0xff]  ;;  %v40_v1 = vld [vmem:[#allocation5] sm:$0xff] }
  0x27   :  { %s50_s7 = sshll.u32 %s144_s6, 4  ;;  %v39_v2 = vld [vmem:[#allocation2 + $0x8] sm:$0xff]  ;;  %v41_v3 = vadd.f32 %v40_v1, %v38_v0  ;;  %s51_s7 = int_to_ptr.vmem [resolvable:$true] %s50_s7 }
  0x28   :  { %v42_v4 = vadd.f32 %v40_v1, %v39_v2  ;;  %s112_s8 = scalar_lea.vmem %s51_s7, 256  ;;  %p117_p3 = scmp.lt.s32.totalorder %s51_s7, %s51_s7 }
  0x29   :  { %43 = vst [vmem:[#allocation7] sm:$0xff] %v41_v3  ;;  %p113_p2 = scmp.ne.s32.totalorder %s51_s7, %s112_s8  ;;  %p118_p4 = scmp.lt.s32.totalorder %s112_s8, %s112_s8 }
  0x2a   :  { %44 = vst [vmem:[#allocation7 + $0x8] sm:$0xff] %v42_v4 }
  0x2b   :  { %p119_p5 = por %p118_p4, %p117_p3 }
  0x2d   :  { %p120_p6 = pnand %p119_p5, %p113_p2 }
  0x2f   :  { %123 = shalt.err (!%p120_p6)
}
  0x30   :  { %s124_s10 = scalar_lea.hbm %s204_s2, 256 }
  0x31   :  { %p125_p7 = scmp.ne.s32.totalorder %s204_s2, %s124_s10  ;;  %p128_p8 = scmp.lt.u32.totalorder %s124_s10, %s204_s2 }
  0x33   :  { %p130_p9 = pnand %p128_p8, %p125_p7 }
  0x35   :  { %133 = shalt.err (!%p130_p9)
}
  0x36   :  { %56 = dma.vmem_to_hbm [thread:$0]  %s51_s7, 256, %s204_s2, [#allocation4], %s141_s19, %s141_s19, %s142_s20  }
  0x37   :  { %138 = dma.done.wait [#allocation4], 256  }
  0x38   :  { %139 = vsyncadd [#allocation4], 4294967040 }
  0x39   :  { %60 = vsyncpa [#allocation3], 1 }
  0x3a   :  { %61 = vsyncpa [#allocation6], 1 }
  0x3b   :  { %62 = vsyncpa [#allocation4], 1 }

</bundles_post_ra>
